<compile_context>
chip_gen: v7x
topology: tpu7x:2x2x1
jax: 0.10.0
libtpu: 0.0.40
codegen_flags: <defaults>
</compile_context>

<pallas_src>
import jax
import jax.numpy as jnp
from jax.experimental import pallas as pl
from jax.experimental.pallas import tpu as pltpu


# ----------------------------------------------------------------------------
# Kernel
# ----------------------------------------------------------------------------
def _make_se_kernel(inv_hw, channels_last):
    """Build the SE kernel for one of the two layouts.

    channels_last=False: x block is (Bt, C, HW)  (spatial on lanes)
    channels_last=True : x block is (Bt, HW, C)  (channels on lanes)

    w1t: (C, R)   b1: (1, R)   w2t: (R, C)   b2: (1, C)
    Weights/biases use constant index_maps, so they stay VMEM-resident
    across grid steps (no re-DMA).
    """
    spatial_axis = 1 if channels_last else 2

    def kernel(x_ref, w1t_ref, b1_ref, w2t_ref, b2_ref, o_ref):
        x = x_ref[...]

        # Squeeze: global average pool with f32 accumulation. The convert is
        # folded into the reduction (no full-slab f32 temporary / cast pass).
        pooled = jnp.sum(x, axis=spatial_axis, dtype=jnp.float32) * inv_hw   # (Bt, C)

        # Excitation: the two 1x1 convs on pooled vectors == dense matmuls,
        # batched over the Bt images of this block (MXU-friendly).
        h = jnp.dot(pooled, w1t_ref[...],
                    preferred_element_type=jnp.float32) + b1_ref[...]        # (Bt, R)
        h = h * jax.nn.sigmoid(h)                                            # SiLU
        s = jnp.dot(h, w2t_ref[...],
                    preferred_element_type=jnp.float32) + b2_ref[...]        # (Bt, C)
        s = jax.nn.sigmoid(s)                                                # (Bt, C) f32

        # Recalibrate in the activation dtype: cast the tiny (Bt, C) scale
        # down once instead of casting the whole slab to f32 and back.
        s = s.astype(o_ref.dtype)
        if channels_last:
            o_ref[...] = x * s[:, None, :]
        else:
            o_ref[...] = x * s[:, :, None]

    return kernel


# ----------------------------------------------------------------------------
# Tiling / VMEM heuristics
# ----------------------------------------------------------------------------
_BLOCK_TARGET_BYTES = 4 << 20         # v5e / v6e: ~4 MiB x-block per grid step
_BLOCK_TARGET_BYTES_V7 = 10 << 20     # v7x: HBM ~2.3x faster -> bigger blocks
_VMEM_SLACK = 2 << 20                 # Mosaic internal scratch / semaphores


def _round_up(n, m):
    return ((n + m - 1) // m) * m


def _padded_vmem_bytes(shape, dtype):
    """VMEM bytes of one buffer holding `shape`, including lane (128) and
    sublane tile padding of the last two dims (sublane multiple grows for
    sub-32-bit dtypes, which pack along sublanes)."""
    itemsize = jnp.dtype(dtype).itemsize
    sublane = 8 * max(1, 4 // itemsize)
    dims = list(shape)
    dims[-1] = _round_up(dims[-1], 128)
    if len(dims) >= 2:
        dims[-2] = _round_up(dims[-2], sublane)
    total = itemsize
    for d in dims:
        total *= d
    return total


def _tpu_params():
    """(tensorcores_per_chip, vmem_capacity_bytes, is_v7x) with safe fallbacks."""
    is_v7 = False
    try:
        is_v7 = "v7" in jax.devices()[0].device_kind.lower()
    except Exception:
        pass
    vmem_cap = (64 << 20) if is_v7 else (128 << 20)
    try:
        vmem_cap = int(pltpu.get_tpu_info().vmem_capacity_bytes)
    except Exception:
        pass
    num_tc = 2 if is_v7 else 1
    return num_tc, vmem_cap, is_v7


def _choose_batch_tile(B, per_image_bytes, block_byte_cap, num_tensorcores):
    """Images per grid step: big enough to amortize the ~0.35us/step pipeline
    overhead, small enough to double-buffer in VMEM. On multi-TensorCore
    chips keep >= 2 pipelined steps per core (even step count preferred) so
    the 'parallel' axis splits across cores with DMA/compute overlap; on
    single-TC chips just take the biggest block that fits."""
    bt = max(1, min(B, block_byte_cap // max(1, per_image_bytes)))
    if num_tensorcores >= 2 and B > 1:
        min_steps = 2 * num_tensorcores
        if B >= min_steps:
            bt = min(bt, max(1, B // min_steps))
        steps = pl.cdiv(B, bt)
        if steps > 1 and steps % 2 == 1 and bt > 1:
            bt_even = pl.cdiv(B, steps + 1)
            if pl.cdiv(B, bt_even) % 2 == 0:
                bt = bt_even
    return bt


def _use_channels_last(C, HW):
    """Put channels on the lane axis when HW would leave lanes badly
    under-used (typical 7x7 / 14x14 SE stages, where C is large) and the
    channel axis is clearly the denser lane choice."""
    if HW % 128 == 0:
        return False
    hw_pad = _round_up(HW, 128) / HW
    c_pad = _round_up(C, 128) / C
    return C >= 64 and c_pad * 1.5 <= hw_pad


# ----------------------------------------------------------------------------
# Wrapper
# ----------------------------------------------------------------------------
def squeeze_excitation(x, w1, b1, w2, b2):
    """x: [B, C, H, W] (NCHW). Returns x * sigmoid(fc2(silu(fc1(avgpool(x))))).

    w1: (R, C) / b1: (R,)  -- Conv2d(in_channels=C -> reduced_dim=R, k=1)
    w2: (C, R) / b2: (C,)  -- Conv2d(reduced_dim=R -> in_channels=C, k=1)

    The pallas_call aliases the flattened input with the output; to actually
    avoid the extra HBM allocation/copy, callers should jit with
    donate_argnums for x (otherwise XLA inserts a defensive copy; still
    correct either way).
    """
    B, C, H, W = x.shape
    R = w1.shape[0]
    HW = H * W
    itemsize = jnp.dtype(x.dtype).itemsize

    channels_last = _use_channels_last(C, HW)
    if channels_last:
        # Lane-dense layout for small / misaligned HW: (B, HW, C).
        # TODO(synk): for NCHW callers this transpose costs an extra HBM pass;
        # accepting NHWC inputs directly (or fusing the transpose into the
        # kernel DMA) would remove it.
        x_flat = jnp.transpose(x, (0, 2, 3, 1)).reshape(B, HW, C)
    else:
        x_flat = x.reshape(B, C, HW)

    # Pre-transpose the 1x1-conv weights so the kernel does row-major
    # (Bt, K) @ (K, N) matmuls with no in-kernel transpose. Biases become
    # broadcastable row vectors.
    w1_t = jnp.transpose(w1).astype(jnp.float32)     # (C, R)
    w2_t = jnp.transpose(w2).astype(jnp.float32)     # (R, C)
    b1_row = b1.reshape(1, R).astype(jnp.float32)
    b2_row = b2.reshape(1, C).astype(jnp.float32)

    num_tc, vmem_cap, is_v7 = _tpu_params()

    # VMEM accounting uses *padded* tile bytes (lane / sublane rounding) plus
    # the double-buffered, VMEM-resident weights.
    per_image_bytes = _padded_vmem_bytes((1,) + x_flat.shape[1:], x.dtype)
    weight_bytes = (_padded_vmem_bytes((C, R), jnp.float32)
                    + _padded_vmem_bytes((1, R), jnp.float32)
                    + _padded_vmem_bytes((R, C), jnp.float32)
                    + _padded_vmem_bytes((1, C), jnp.float32))
    budget = min(int(0.75 * vmem_cap), 96 << 20)
    target = _BLOCK_TARGET_BYTES_V7 if is_v7 else _BLOCK_TARGET_BYTES
    # in-block and out-block are each double-buffered -> 4*block + 2*weights.
    block_cap = max(per_image_bytes,
                    min(target, (budget - 2 * weight_bytes - _VMEM_SLACK) // 4))
    bt = _choose_batch_tile(B, per_image_bytes, block_cap, num_tc)
    num_steps = pl.cdiv(B, bt)       # ragged tail block handled by Pallas

    # TODO(synk): if a single image's padded block (4x buffered) exceeds the
    # VMEM budget (very large C*HW), this needs an HW-tiled two-pass variant
    # (accumulate pooled sums across HW tiles, finalize s, then apply s).
    vmem_limit = int(min(max(4 * bt * per_image_bytes + 2 * weight_bytes + _VMEM_SLACK,
                             16 << 20),
                         budget))

    cost = pl.CostEstimate(
        flops=int(2 * B * C * HW + 4 * B * C * R),
        transcendentals=int(2 * B * R + B * C),
        bytes_accessed=int(2 * B * C * HW * itemsize + (2 * R * C + R + C) * 4),
    )

    kernel = _make_se_kernel(1.0 / HW, channels_last)
    block_shape = (bt,) + x_flat.shape[1:]

    out = pl.pallas_call(
        kernel,
        out_shape=jax.ShapeDtypeStruct(x_flat.shape, x.dtype),
        grid_spec=pltpu.PrefetchScalarGridSpec(
            num_scalar_prefetch=0,
            grid=(num_steps,),
            in_specs=[
                pl.BlockSpec(block_shape, lambda i: (i, 0, 0)),   # x slab
                pl.BlockSpec((C, R), lambda i: (0, 0)),           # w1^T (resident)
                pl.BlockSpec((1, R), lambda i: (0, 0)),           # b1
                pl.BlockSpec((R, C), lambda i: (0, 0)),           # w2^T (resident)
                pl.BlockSpec((1, C), lambda i: (0, 0)),           # b2
            ],
            out_specs=pl.BlockSpec(block_shape, lambda i: (i, 0, 0)),
        ),
        compiler_params=pltpu.CompilerParams(
            dimension_semantics=("parallel",),
            vmem_limit_bytes=vmem_limit,
        ),
        cost_estimate=cost,
        # Output matches x_flat's shape/dtype: alias them so no extra HBM
        # allocation is needed when the caller donates x.
        input_output_aliases={0: 0},
    )(x_flat, w1_t, b1_row, w2_t, b2_row)

    if channels_last:
        return out.reshape(B, H, W, C).transpose(0, 3, 1, 2)
    return out.reshape(B, C, H, W)


# ----------------------------------------------------------------------------
# Reference & self-test
# ----------------------------------------------------------------------------
def _reference(x, w1, b1, w2, b2):
    pooled = jnp.mean(x, axis=(2, 3))                    # (B, C)
    h = pooled @ w1.T + b1                               # (B, R)
    h = h * jax.nn.sigmoid(h)                            # SiLU
    s = jax.nn.sigmoid(h @ w2.T + b2)                    # (B, C)
    return x * s[:, :, None, None]


if __name__ == "__main__":
    key = jax.random.PRNGKey(0)

    # Case 1: lane-dense spatial layout (HW = 256 is a multiple of 128).
    B, C, H, W, R = 2, 4, 16, 16, 2
    kx, kw1, kb1, kw2, kb2, key = jax.random.split(key, 6)
    x = jax.random.normal(kx, (B, C, H, W), dtype=jnp.float32)
    w1 = jax.random.normal(kw1, (R, C), dtype=jnp.float32) * 0.1
    b1 = jax.random.normal(kb1, (R,), dtype=jnp.float32) * 0.1
    w2 = jax.random.normal(kw2, (C, R), dtype=jnp.float32) * 0.1
    b2 = jax.random.normal(kb2, (C,), dtype=jnp.float32) * 0.1

    ref = _reference(x, w1, b1, w2, b2)
    out = jax.block_until_ready(squeeze_excitation(x, w1, b1, w2, b2))
    assert out.shape == (B, C, H, W)
    assert jnp.allclose(out, ref, atol=1e-5, rtol=1e-5), "case 1 mismatch"

    # Case 2: misaligned small spatial (7x7), large C -> channels-last path.
    B2, C2, H2, W2, R2 = 2, 128, 7, 7, 32
    kx, kw1, kb1, kw2, kb2, key = jax.random.split(key, 6)
    x2 = jax.random.normal(kx, (B2, C2, H2, W2), dtype=jnp.float32)
    w1_2 = jax.random.normal(kw1, (R2, C2), dtype=jnp.float32) * 0.1
    b1_2 = jax.random.normal(kb1, (R2,), dtype=jnp.float32) * 0.1
    w2_2 = jax.random.normal(kw2, (C2, R2), dtype=jnp.float32) * 0.1
    b2_2 = jax.random.normal(kb2, (C2,), dtype=jnp.float32) * 0.1

    ref2 = _reference(x2, w1_2, b1_2, w2_2, b2_2)
    out2 = jax.block_until_ready(squeeze_excitation(x2, w1_2, b1_2, w2_2, b2_2))
    assert out2.shape == (B2, C2, H2, W2)
    # MXU default-precision f32 matmuls may differ slightly from the XLA ref.
    assert jnp.allclose(out2, ref2, atol=5e-3, rtol=5e-3), "case 2 mismatch"

    print("KERNEL_OK")
</pallas_src>

<mosaic_0001>
module attributes {stable_mosaic.version = 11 : i64} {
  func.func @kernel(%arg0: i32, %arg1: memref<2x4x256xf32, #tpu.memory_space<vmem>>, %arg2: memref<4x2xf32, #tpu.memory_space<vmem>>, %arg3: memref<1x2xf32, #tpu.memory_space<vmem>>, %arg4: memref<2x4xf32, #tpu.memory_space<vmem>>, %arg5: memref<1x4xf32, #tpu.memory_space<vmem>>, %arg6: memref<2x4x256xf32, #tpu.memory_space<vmem>>) attributes {dimension_semantics = [#tpu.dimension_semantics<parallel>], iteration_bounds = array<i64: 1>, scalar_prefetch = 0 : i64, scratch_operands = 0 : i64, tpu.core_type = #tpu.core_type<tc>, window_params = [{transform_indices = @transform_0, window_bounds = array<i64: 2, 4, 256>}, {pipeline_mode = #tpu.pipeline_mode<synchronous>, transform_indices = @transform_1, window_bounds = array<i64: 4, 2>}, {pipeline_mode = #tpu.pipeline_mode<synchronous>, transform_indices = @transform_2, window_bounds = array<i64: 1, 2>}, {pipeline_mode = #tpu.pipeline_mode<synchronous>, transform_indices = @transform_3, window_bounds = array<i64: 2, 4>}, {pipeline_mode = #tpu.pipeline_mode<synchronous>, transform_indices = @transform_4, window_bounds = array<i64: 1, 4>}, {transform_indices = @transform_5, window_bounds = array<i64: 2, 4, 256>}]} {
    %c0 = arith.constant 0 : index
    %c0_0 = arith.constant 0 : index
    %c0_1 = arith.constant 0 : index
    %0 = vector.load %arg1[%c0, %c0_0, %c0_1] : memref<2x4x256xf32, #tpu.memory_space<vmem>>, vector<2x4x256xf32>
    %cst = arith.constant dense<0.000000e+00> : vector<2x4xf32>
    %1 = vector.multi_reduction <add>, %0, %cst [2] : vector<2x4x256xf32> to vector<2x4xf32>
    %cst_2 = arith.constant 3.906250e-03 : f32
    %2 = vector.broadcast %cst_2 : f32 to vector<2x4xf32>
    %3 = arith.mulf %1, %2 : vector<2x4xf32>
    %c0_3 = arith.constant 0 : index
    %c0_4 = arith.constant 0 : index
    %4 = vector.load %arg2[%c0_3, %c0_4] : memref<4x2xf32, #tpu.memory_space<vmem>>, vector<4x2xf32>
    %cst_5 = arith.constant dense<0.000000e+00> : vector<2x2xf32>
    %5 = tpu.matmul %3, %4, %cst_5 {dimension_numbers = #tpu.dot_dimension_numbers<[1], [0], [0], [1], [0, 0, 1, 1], [], []>} : vector<2x4xf32>, vector<4x2xf32>, vector<2x2xf32> -> vector<2x2xf32>
    %c0_6 = arith.constant 0 : index
    %c0_7 = arith.constant 0 : index
    %6 = vector.load %arg3[%c0_6, %c0_7] : memref<1x2xf32, #tpu.memory_space<vmem>>, vector<1x2xf32>
    %7 = vector.broadcast %6 : vector<1x2xf32> to vector<2x2xf32>
    %8 = arith.addf %5, %7 : vector<2x2xf32>
    %9 = arith.negf %8 : vector<2x2xf32>
    %10 = math.exp %9 : vector<2x2xf32>
    %cst_8 = arith.constant 1.000000e+00 : f32
    %11 = vector.broadcast %cst_8 : f32 to vector<2x2xf32>
    %12 = arith.addf %11, %10 : vector<2x2xf32>
    %13 = arith.divf %11, %12 : vector<2x2xf32>
    %14 = arith.mulf %8, %13 : vector<2x2xf32>
    %c0_9 = arith.constant 0 : index
    %c0_10 = arith.constant 0 : index
    %15 = vector.load %arg4[%c0_9, %c0_10] : memref<2x4xf32, #tpu.memory_space<vmem>>, vector<2x4xf32>
    %cst_11 = arith.constant dense<0.000000e+00> : vector<2x4xf32>
    %16 = tpu.matmul %14, %15, %cst_11 {dimension_numbers = #tpu.dot_dimension_numbers<[1], [0], [0], [1], [0, 0, 1, 1], [], []>} : vector<2x2xf32>, vector<2x4xf32>, vector<2x4xf32> -> vector<2x4xf32>
    %c0_12 = arith.constant 0 : index
    %c0_13 = arith.constant 0 : index
    %17 = vector.load %arg5[%c0_12, %c0_13] : memref<1x4xf32, #tpu.memory_space<vmem>>, vector<1x4xf32>
    %18 = vector.broadcast %17 : vector<1x4xf32> to vector<2x4xf32>
    %19 = arith.addf %16, %18 : vector<2x4xf32>
    %20 = arith.negf %19 : vector<2x4xf32>
    %21 = math.exp %20 : vector<2x4xf32>
    %cst_14 = arith.constant 1.000000e+00 : f32
    %22 = vector.broadcast %cst_14 : f32 to vector<2x4xf32>
    %23 = arith.addf %22, %21 : vector<2x4xf32>
    %24 = arith.divf %22, %23 : vector<2x4xf32>
    %25 = vector.shape_cast %24 : vector<2x4xf32> to vector<2x4x1xf32>
    %26 = vector.broadcast %25 : vector<2x4x1xf32> to vector<2x4x256xf32>
    %27 = arith.mulf %0, %26 : vector<2x4x256xf32>
    %c0_15 = arith.constant 0 : index
    %c0_16 = arith.constant 0 : index
    %c0_17 = arith.constant 0 : index
    %28 = vector.load %arg6[%c0_15, %c0_16, %c0_17] : memref<2x4x256xf32, #tpu.memory_space<vmem>>, vector<2x4x256xf32>
    tpu.vector_store %arg6[%c0_15, %c0_16, %c0_17], %27 {strides = array<i32>} : memref<2x4x256xf32, #tpu.memory_space<vmem>>, vector<2x4x256xf32>,
    return
  }
  func.func @transform_0(%arg0: i32) -> (i32, i32, i32) {
    %c0_i32 = arith.constant 0 : i32
    %c0_i32_0 = arith.constant 0 : i32
    %c0_i32_1 = arith.constant 0 : i32
    return %arg0, %c0_i32, %c0_i32_0 : i32, i32, i32
  }
  func.func @transform_1(%arg0: i32) -> (i32, i32) {
    %c0_i32 = arith.constant 0 : i32
    %c0_i32_0 = arith.constant 0 : i32
    %c0_i32_1 = arith.constant 0 : i32
    return %c0_i32, %c0_i32_0 : i32, i32
  }
  func.func @transform_2(%arg0: i32) -> (i32, i32) {
    %c0_i32 = arith.constant 0 : i32
    %c0_i32_0 = arith.constant 0 : i32
    %c0_i32_1 = arith.constant 0 : i32
    return %c0_i32, %c0_i32_0 : i32, i32
  }
  func.func @transform_3(%arg0: i32) -> (i32, i32) {
    %c0_i32 = arith.constant 0 : i32
    %c0_i32_0 = arith.constant 0 : i32
    %c0_i32_1 = arith.constant 0 : i32
    return %c0_i32, %c0_i32_0 : i32, i32
  }
  func.func @transform_4(%arg0: i32) -> (i32, i32) {
    %c0_i32 = arith.constant 0 : i32
    %c0_i32_0 = arith.constant 0 : i32
    %c0_i32_1 = arith.constant 0 : i32
    return %c0_i32, %c0_i32_0 : i32, i32
  }
  func.func @transform_5(%arg0: i32) -> (i32, i32, i32) {
    %c0_i32 = arith.constant 0 : i32
    %c0_i32_0 = arith.constant 0 : i32
    %c0_i32_1 = arith.constant 0 : i32
    return %arg0, %c0_i32, %c0_i32_0 : i32, i32, i32
  }
}

</mosaic_0001>

<bundles_post_ra>
// kernel: tpu_custom_call.1
= control target key start
LH: loop header
LB: loop body
LE: loop exit
PB: predicated region body
PF: predicated region fallthrough
CT: control target
= control target key end

     0   :  { %10 = vsyncpa [#allocation3], 0  ;;  %s489_s0 = inlined_call_operand.hbm [shape: f32[2,4,256], index: 0, kind: input, shape index: {}, may-alias: {0,5}]   ;;  %s490_s1 = inlined_call_operand.vmem [shape: f32[4,2], index: 1, kind: input, shape index: {}]   ;;  %s491_s2 = inlined_call_operand.vmem [shape: f32[1,2], index: 2, kind: input, shape index: {}]   ;;  %s492_s3 = inlined_call_operand.vmem [shape: f32[2,4], index: 3, kind: input, shape index: {}]   ;;  %s493_s4 = inlined_call_operand.vmem [shape: f32[1,4], index: 4, kind: input, shape index: {}]   ;;  %s494_s5 = inlined_call_operand.hbm [shape: f32[2,4,256], index: 5, kind: output, shape index: {}, may-alias: {0,5}]  }
   0x1   :  { %11 = vsyncpa [#allocation4], 0  ;;  %s393_s18 = smov [#allocation2]   ;;  %s345_s22 = scalar_lea.hbm %s489_s0, 256 }
   0x2   :  { %s17_s19 = sshll.u32 %s393_s18, 4  ;;  %p346_p0 = scmp.ne.s32.totalorder %s489_s0, %s345_s22  ;;  %s18_s19 = int_to_ptr.vmem [resolvable:$true] %s17_s19 }
   0x3   :  { %p349_p1 = scmp.lt.u32.totalorder %s345_s22, %s489_s0 }
   0x5   :  { %p351_p2 = pnand %p349_p1, %p346_p0 }
   0x7   :  { %354 = shalt.err (!%p351_p2)
}
   0x8   :  { %s355_s27 = scalar_lea.vmem %s18_s19, 256  ;;  %p360_p4 = scmp.lt.s32.totalorder %s18_s19, %s18_s19 }
   0x9   :  { %p356_p3 = scmp.ne.s32.totalorder %s18_s19, %s355_s27  ;;  %p361_p5 = scmp.lt.s32.totalorder %s355_s27, %s355_s27 }
   0xb   :  { %p362_p6 = por %p361_p5, %p360_p4 }
   0xd   :  { %p363_p7 = pnand %p362_p6, %p356_p3 }
   0xf   :  { %366 = shalt.err (!%p363_p7)
}
  0x10   :  { %s394_s28 = smov 128   ;;  %s395_s29 = smov 8  }
  0x11   :  { %23 = dma.hbm_to_vmem [thread:$0]  %s489_s0, 256, %s18_s19, [#allocation3], %s394_s28, %s394_s28, %s395_s29  }
  0x12   :  { %389 = dma.done.wait [#allocation3], 256  }
  0x13   :  { %390 = vsyncadd [#allocation3], 4294967040  ;;  %vm43_vm0 = vcmask 1043456   ;;  %v445_v0 = vld [vmem:[#allocation2] sm:$0xff]  ;;  %v447_v1 = vld [vmem:[#allocation2 + $0x8] sm:$0xff]  ;;  %v396_v11 = vmov 0.0   ;;  %v66_v12 = vlaneseq }
  0x14   :  { %v39_v2 = vcombine.high %v445_v0, %v445_v0  ;;  %v44_v3 = vsel %vm43_vm0, %v445_v0, 0.0  ;;  %v40_v4 = vcombine.high %v447_v1, %v447_v1  ;;  %v49_v6 = vsel %vm43_vm0, %v447_v1, 0.0  ;;  %v56_v10 = vld [vmem:[%s490_s1] sm:$0xf]  ;;  %318 = vmatprep.subr.mxu0 %v396_v11  ;;  %323 = vmatprep.subr.mxu1 %v396_v11 }
  0x15   :  { %vm397_vm1 = vmmov 0   ;;  %319 = vmatpush3.msk.msra.mxu0 %vm43_vm0, %v56_v10  ;;  %v67_v13 = vand.u32 127, %v66_v12  ;;  %v69_v14 = vshrl.u32 %v66_v12, 7  ;;  %vm76_vm2 = vcmask 1041409   ;;  %v161_v23 = vld [vmem:[%s492_s3] sm:$0x3] }
  0x16   :  { %v45_v5 = vsel %vm43_vm0, %v39_v2, 0.0  ;;  %v50_v7 = vsel %vm43_vm0, %v40_v4, 0.0  ;;  %320 = vmatprep.mubr.msk.f32.mxu0 %vm397_vm1, %v396_v11  ;;  %325 = vmatprep.mubr.msk.f32.mxu1 %vm397_vm1, %v396_v11  ;;  %vm78_vm3 = vcmask 31744   ;;  %vm173_vm4 = vcmask 1041408   ;;  %v306_v24 = vld [vmem:[%s491_s2] ss:$0 sm:$0xff] }
  0x17   :  { %v46_v8 = vadd.f32 %v45_v5, %v44_v3  ;;  %v51_v9 = vadd.f32 %v50_v7, %v49_v6  ;;  %v70_v16 = vsub.s32 %v67_v13, %v69_v14  ;;  %324 = vmatpush3.msk.msra.mxu1 %vm173_vm4, %v161_v23  ;;  %vm169_vm5 = vcmask 15360   ;;  %v310_v33 = vld [vmem:[%s493_s4] ss:$0 sm:$0xff]  ;;  %s399_s2 = smov [#allocation5]  }
  0x18   :  { %v255_v40 = vsub.s32 0, %v69_v14  ;;  %v262_v43 = vsub.s32 1, %v69_v14  ;;  %v398_v45 = vmov 839922192   ;;  %s294_s4 = sshll.u32 %s399_s2, 4  ;;  %s295_s4 = int_to_ptr.vmem [resolvable:$true] %s294_s4 }
  0x19   :  { %47 = vadd.xlane.f32.xlu0 %v46_v8  ;;  %v270_v46 = vunpack.c.l.s4 %v398_v45  ;;  %s367_s12 = scalar_lea.vmem %s295_s4, 256  ;;  %p372_p9 = scmp.lt.s32.totalorder %s295_s4, %s295_s4 }
  0x1a   :  { %p368_p8 = scmp.ne.s32.totalorder %s295_s4, %s367_s12  ;;  %p373_p10 = scmp.lt.s32.totalorder %s367_s12, %s367_s12 }
  0x1b   :  { %v271_v47 = vunpack.c.0.s8 %v270_v46 }
  0x1c   :  { %p374_p11 = por %p373_p10, %p372_p9 }
  0x1d   :  { %52 = vadd.xlane.f32.xlu0 %v51_v9  ;;  %v274_v48 = vsub.s32 %v271_v47, %v69_v14 }
  0x1e   :  { %p375_p12 = pnand %p374_p11, %p368_p8 }
  0xa6   :  { %v48_v15 = vpop.xlane.xlu0 %47 }
  0xa7   :  { %v54_v17 = vmul.f32 0.00390625, %v48_v15 }
  0xa9   :  { %v71_v20 = vrot.slane %v54_v17, %v70_v16 }
  0xaa   :  { %v53_v18 = vpop.xlane.xlu0 %52 }
  0xab   :  { %v55_v19 = vmul.f32 0.00390625, %v53_v18 }
  0xad   :  { %v75_v21 = vrot.slane %v55_v19, %v70_v16 }
  0xaf   :  { %v77_v22 = vsel %vm76_vm2, %v75_v21, %v71_v20 }
  0xb0   :  { %321 = vmatmul.mubr.msk.f32.vlgmr.msra.gmra.mrb[0].mxu0 %vm78_vm3, %v77_v22 }
 0x183   :  { %v150_v25 = vpop.f32.mrb[0].mxu0 }
 0x184   :  { %v151_v26 = vadd.f32 %v306_v24, %v150_v25  ;;  %v322_v27 = vpop.f32.mrb[1].mxu0 }
 0x186   :  { %v309_v28 = vmul.f32 -1.442695, %v151_v26 }
 0x188   :  { %337 = vpow2.f32 %v309_v28 }
 0x192   :  { %v338_v29 = vpop.eup %337 }
 0x193   :  { %v157_v30 = vadd.f32 1.0, %v338_v29 }
 0x195   :  { %339 = vrcp.f32 %v157_v30 }
 0x19f   :  { %v340_v31 = vpop.eup %339 }
 0x1a0   :  { %v160_v32 = vmul.f32 %v340_v31, %v151_v26 }
 0x1a2   :  { %326 = vmatmul.mubr.msk.f32.vlgmr.msra.gmra.mrb[0].mxu1 %vm169_vm5, %v160_v32 }
 0x275   :  { %v243_v34 = vpop.f32.mrb[0].mxu1 }
 0x276   :  { %v244_v35 = vadd.f32 %v310_v33, %v243_v34  ;;  %v327_v36 = vpop.f32.mrb[1].mxu1 }
 0x278   :  { %v313_v37 = vmul.f32 -1.442695, %v244_v35 }
 0x27a   :  { %341 = vpow2.f32 %v313_v37 }
 0x284   :  { %v342_v38 = vpop.eup %341 }
 0x285   :  { %v250_v39 = vadd.f32 1.0, %v342_v38 }
 0x287   :  { %343 = vrcp.f32 %v250_v39 }
 0x291   :  { %v344_v41 = vpop.eup %343 }
 0x292   :  { %v256_v42 = vrot.slane %v344_v41, %v255_v40  ;;  %v263_v44 = vrot.slane %v344_v41, %v262_v43 }
 0x294   :  { %258 = vbcast.lane.b32.xlu1 %v256_v42, 256 }
 0x298   :  { %265 = vbcast.lane.b32.xlu1 %v263_v44, 256 }
 0x306   :  { %v259_v49 = vpop.permute.xlu1 %258 }
 0x307   :  { %v275_v50 = vrot.slane %v259_v49, %v274_v48 }
 0x309   :  { %v285_v51 = vmul.f32 %v275_v50, %v445_v0 }
 0x30a   :  { %v266_v52 = vpop.permute.xlu1 %265 }
 0x30b   :  { %287 = vst [vmem:[#allocation5] sm:$0xff] %v285_v51  ;;  %v282_v53 = vrot.slane %v266_v52, %v274_v48 }
 0x30d   :  { %v286_v54 = vmul.f32 %v282_v53, %v447_v1 }
 0x30f   :  { %288 = vst [vmem:[#allocation5 + $0x8] sm:$0xff] %v286_v54 }
 0x310   :  { %378 = shalt.err (!%p375_p12)
}
 0x311   :  { %s379_s15 = scalar_lea.hbm %s494_s5, 256 }
 0x312   :  { %p380_p13 = scmp.ne.s32.totalorder %s494_s5, %s379_s15  ;;  %p383_p0 = scmp.lt.u32.totalorder %s379_s15, %s494_s5 }
 0x314   :  { %p385_p1 = pnand %p383_p0, %p380_p13 }
 0x316   :  { %388 = shalt.err (!%p385_p1)
}
 0x317   :  { %300 = dma.vmem_to_hbm [thread:$0]  %s295_s4, 256, %s494_s5, [#allocation4], %s394_s28, %s394_s28, %s395_s29  }
 0x318   :  { %391 = dma.done.wait [#allocation4], 256  }
 0x319   :  { %392 = vsyncadd [#allocation4], 4294967040 }
 0x31a   :  { %304 = vsyncpa [#allocation3], 1 }
 0x31b   :  { %305 = vsyncpa [#allocation4], 1 }

</bundles_post_ra>
